<compile_context>
chip_gen: v7x
topology: tpu7x:2x2x1
jax: 0.10.0
libtpu: 0.0.40
codegen_flags: <defaults>
</compile_context>

<pallas_src>
import functools

import jax
import jax.numpy as jnp
from jax.experimental import pallas as pl
from jax.experimental.pallas import tpu as pltpu

KSIZE = 3        # conv kernel size (padding=1)
POOL = 6         # AvgPool1d kernel / stride
C_IN, C_MID, C_OUT = 3, 16, 32


# ---------------------------------------------------------------------------
# Kernel A: conv1 + ReLU + conv2 + ReLU + AvgPool1d(6)
#   one batch element per grid step, NCL layout (channels x length).
#   x_ref  : (1, 3, L)        matmul dtype (f32 or bf16)
#   w1_ref : (16, 9)          fused-tap weights, [o, k*3  + c] = w1[o, c, k]
#   b1_ref : (16, 1)          f32
#   w2_ref : (32, 48)         fused-tap weights, [o, k*16 + c] = w2[o, c, k]
#   b2_ref : (32, 1)          f32
#   pm_ref : (L, P)           constant pooling matrix, 1/6 on window blocks
#   out_ref: (1, 32, P)       f32
# ---------------------------------------------------------------------------
def conv_pool_kernel(x_ref, w1_ref, b1_ref, w2_ref, b2_ref, pm_ref, out_ref):
    mmdt = w1_ref.dtype                       # matmul operand dtype
    L = x_ref.shape[2]

    x2 = x_ref[0].astype(jnp.float32)         # (3, L)

    def stack_taps(h, c):
        # rows [h[:, t-1]; h[:, t]; h[:, t+1]] stacked along the contraction
        # axis; sequence boundary zeroed (Conv1d padding=1).
        zcol = jnp.zeros((c, 1), jnp.float32)
        prev = jnp.concatenate([zcol, h[:, :L - 1]], axis=1)
        nxt = jnp.concatenate([h[:, 1:], zcol], axis=1)
        return jnp.concatenate([prev, h, nxt], axis=0)     # (3*c, L)

    # conv1 (+bias, ReLU): one (16, 9) @ (9, L) MXU matmul (taps fused on K).
    h1 = jnp.dot(w1_ref[...], stack_taps(x2, C_IN).astype(mmdt),
                 preferred_element_type=jnp.float32)
    h1 = jnp.maximum(h1 + b1_ref[...], 0.0)                 # (16, L) f32

    # conv2 (+bias, ReLU): one (32, 48) @ (48, L) MXU matmul.
    h2 = jnp.dot(w2_ref[...], stack_taps(h1, C_MID).astype(mmdt),
                 preferred_element_type=jnp.float32)
    h2 = jnp.maximum(h2 + b2_ref[...], 0.0)                 # (32, L) f32

    # AvgPool1d(6): one (32, L) @ (L, P) matmul against the constant matrix.
    out_ref[0] = jnp.dot(h2.astype(mmdt), pm_ref[...],
                         preferred_element_type=jnp.float32)  # (32, P)


# ---------------------------------------------------------------------------
# Kernel B: Linear(32 -> 1) + Sigmoid on the view(-1, 32) rows (tiny).
# ---------------------------------------------------------------------------
def linear_sigmoid_kernel(flat_ref, wl_ref, bl_ref, out_ref):
    logits = jnp.dot(flat_ref[...], wl_ref[...],
                     preferred_element_type=jnp.float32) + bl_ref[...]
    out_ref[...] = jax.nn.sigmoid(logits)


@functools.partial(jax.jit, static_argnames=("matmul_dtype",))
def net_model1_forward(x_ncl, params, *, matmul_dtype=jnp.float32):
    """x_ncl: (N, 3, L) float32, PyTorch NCL layout -> (N * (L // 6), 1)."""
    w1, b1, w2, b2, wl, bl = params
    N, cin, L = x_ncl.shape
    assert cin == C_IN and L >= POOL
    P = L // POOL

    # ---- one-time operand prep (tiny XLA ops) ----
    # fused-tap weight matrices: [o, k*Cin + c] = w[o, c, k]
    w1s = jnp.transpose(w1, (0, 2, 1)).reshape(C_MID, KSIZE * C_IN).astype(matmul_dtype)
    w2s = jnp.transpose(w2, (0, 2, 1)).reshape(C_OUT, KSIZE * C_MID).astype(matmul_dtype)
    b1c = b1.reshape(C_MID, 1).astype(jnp.float32)
    b2c = b2.reshape(C_OUT, 1).astype(jnp.float32)
    # constant AvgPool1d(6) matrix: pm[t, p] = 1/6 iff t // 6 == p (t < 6*P)
    pm = jnp.where((jnp.arange(L) // POOL)[:, None] == jnp.arange(P)[None, :],
                   1.0 / POOL, 0.0).astype(matmul_dtype)
    x_in = x_ncl.astype(matmul_dtype)

    const2d = lambda n: (0, 0)   # weights stay VMEM-resident across the grid

    pooled = pl.pallas_call(
        conv_pool_kernel,
        out_shape=jax.ShapeDtypeStruct((N, C_OUT, P), jnp.float32),
        grid=(N,),
        in_specs=[
            pl.BlockSpec((1, C_IN, L), lambda n: (n, 0, 0)),      # streamed x
            pl.BlockSpec((C_MID, KSIZE * C_IN), const2d),
            pl.BlockSpec((C_MID, 1), const2d),
            pl.BlockSpec((C_OUT, KSIZE * C_MID), const2d),
            pl.BlockSpec((C_OUT, 1), const2d),
            pl.BlockSpec((L, P), const2d),
        ],
        out_specs=pl.BlockSpec((1, C_OUT, P), lambda n: (n, 0, 0)),
        compiler_params=pltpu.CompilerParams(
            dimension_semantics=("parallel",),        # 2 TCs on v7x
            vmem_limit_bytes=32 * 1024 * 1024),
    )(x_in, w1s, b1c, w2s, b2c, pm)

    # PyTorch x.view(-1, 32): pooled is already (N, 32, P) NCL-contiguous, so
    # the view is a free row-major reshape (no transpose, no extra HBM pass).
    flat = pooled.reshape(N * P, C_OUT)

    out = pl.pallas_call(
        linear_sigmoid_kernel,
        out_shape=jax.ShapeDtypeStruct((N * P, 1), jnp.float32),
        in_specs=[pl.BlockSpec(memory_space=pltpu.MemorySpace.VMEM)] * 3,
        out_specs=pl.BlockSpec(memory_space=pltpu.MemorySpace.VMEM),
    )(flat, wl.T.astype(jnp.float32), bl.reshape(1, 1).astype(jnp.float32))
    return out


# ---------------------------------------------------------------------------
# Deterministic parameter init (PyTorch-default-style uniform bounds)
# ---------------------------------------------------------------------------
def init_params(key):
    ks = jax.random.split(key, 6)

    def u(k, shape, bound):
        return jax.random.uniform(k, shape, jnp.float32, -bound, bound)

    b1w = (1.0 / (C_IN * KSIZE)) ** 0.5
    b2w = (1.0 / (C_MID * KSIZE)) ** 0.5
    blw = (1.0 / C_OUT) ** 0.5
    w1 = u(ks[0], (C_MID, C_IN, KSIZE), b1w)      # Conv1d(3,16,3) weight
    b1 = u(ks[1], (C_MID,), b1w)
    w2 = u(ks[2], (C_OUT, C_MID, KSIZE), b2w)     # Conv1d(16,32,3) weight
    b2 = u(ks[3], (C_OUT,), b2w)
    wl = u(ks[4], (1, C_OUT), blw)                # Linear(32,1) weight
    bl = u(ks[5], (1,), blw)
    return (w1, b1, w2, b2, wl, bl)


# ---------------------------------------------------------------------------
# Pure-JAX reference of the PyTorch forward (independent check)
# ---------------------------------------------------------------------------
def ref_forward(x, params):
    w1, b1, w2, b2, wl, bl = params

    def conv1d(h, w, b):  # h (N,C,L), w (O,C,3), padding=1
        N, C, L = h.shape
        hp = jnp.pad(h, ((0, 0), (0, 0), (1, 1)))
        out = jnp.zeros((N, w.shape[0], L), jnp.float32)
        for k in range(KSIZE):
            out = out + jnp.einsum('ncl,oc->nol', hp[:, :, k:k + L], w[:, :, k])
        return out + b[None, :, None]

    h = jax.nn.relu(conv1d(x, w1, b1))
    h = jax.nn.relu(conv1d(h, w2, b2))
    N, C, L = h.shape
    P = L // POOL
    pooled = h[:, :, :P * POOL].reshape(N, C, P, POOL).mean(axis=3)
    flat = pooled.reshape(-1, C_OUT)
    return jax.nn.sigmoid(flat @ wl.T + bl)


if __name__ == "__main__":
    key = jax.random.PRNGKey(0)
    pkey, k1, k2 = jax.random.split(key, 3)
    params = init_params(pkey)

    # Case 1: the module's natural tiny shape (L=6 -> one pooled position).
    x_small = jax.random.normal(k1, (2, C_IN, 6), jnp.float32)
    out_s = jax.block_until_ready(net_model1_forward(x_small, params))
    ref_s = ref_forward(x_small, params)
    assert out_s.shape == ref_s.shape == (2, 1)
    # tolerance allows for MXU default-precision in the pooling matmul
    assert jnp.allclose(out_s, ref_s, atol=3e-3, rtol=0.0), (out_s, ref_s)

    # Case 2: longer sequence (L=48 -> P=8); view(-1,32) mixes channels and
    # pooled positions exactly like PyTorch.
    x = jax.random.normal(k2, (4, C_IN, 48), jnp.float32)
    out = jax.block_until_ready(net_model1_forward(x, params))
    ref = ref_forward(x, params)
    assert out.shape == ref.shape == (4 * 8, 1)
    assert jnp.allclose(out, ref, atol=3e-3, rtol=0.0), float(jnp.abs(out - ref).max())

    # Case 3: bf16 matmul operands (f32 accumulation), loose check vs f32 ref.
    out_bf16 = jax.block_until_ready(
        net_model1_forward(x, params, matmul_dtype=jnp.bfloat16))
    assert out_bf16.shape == ref.shape
    assert bool(jnp.all(jnp.isfinite(out_bf16)))
    assert jnp.allclose(out_bf16, ref, atol=5e-2, rtol=0.0), \
        float(jnp.abs(out_bf16 - ref).max())

    print("KERNEL_OK")
</pallas_src>

<mosaic_0001>
module attributes {stable_mosaic.version = 11 : i64} {
  func.func @linear_sigmoid_kernel(%arg0: memref<2x32xf32, #tpu.memory_space<vmem>>, %arg1: memref<32x1xf32, #tpu.memory_space<vmem>>, %arg2: memref<1x1xf32, #tpu.memory_space<vmem>>, %arg3: memref<2x1xf32, #tpu.memory_space<vmem>>) attributes {dimension_semantics = [], scalar_prefetch = 0 : i64, scratch_operands = 0 : i64, tpu.core_type = #tpu.core_type<tc>} {
    %c0 = arith.constant 0 : index
    %c0_0 = arith.constant 0 : index
    %0 = vector.load %arg0[%c0, %c0_0] : memref<2x32xf32, #tpu.memory_space<vmem>>, vector<2x32xf32>
    %c0_1 = arith.constant 0 : index
    %c0_2 = arith.constant 0 : index
    %1 = vector.load %arg1[%c0_1, %c0_2] : memref<32x1xf32, #tpu.memory_space<vmem>>, vector<32x1xf32>
    %cst = arith.constant dense<0.000000e+00> : vector<2x1xf32>
    %2 = tpu.matmul %0, %1, %cst {dimension_numbers = #tpu.dot_dimension_numbers<[1], [0], [0], [1], [0, 0, 1, 1], [], []>} : vector<2x32xf32>, vector<32x1xf32>, vector<2x1xf32> -> vector<2x1xf32>
    %c0_3 = arith.constant 0 : index
    %c0_4 = arith.constant 0 : index
    %3 = vector.load %arg2[%c0_3, %c0_4] : memref<1x1xf32, #tpu.memory_space<vmem>>, vector<1x1xf32>
    %4 = vector.broadcast %3 : vector<1x1xf32> to vector<2x1xf32>
    %5 = arith.addf %2, %4 : vector<2x1xf32>
    %6 = arith.negf %5 : vector<2x1xf32>
    %7 = math.exp %6 : vector<2x1xf32>
    %cst_5 = arith.constant 1.000000e+00 : f32
    %8 = vector.broadcast %cst_5 : f32 to vector<2x1xf32>
    %9 = arith.addf %8, %7 : vector<2x1xf32>
    %10 = arith.divf %8, %9 : vector<2x1xf32>
    %c0_6 = arith.constant 0 : index
    %c0_7 = arith.constant 0 : index
    %11 = vector.load %arg3[%c0_6, %c0_7] : memref<2x1xf32, #tpu.memory_space<vmem>>, vector<2x1xf32>
    tpu.vector_store %arg3[%c0_6, %c0_7], %10 {strides = array<i32>} : memref<2x1xf32, #tpu.memory_space<vmem>>, vector<2x1xf32>,
    return
  }
}

module attributes {stable_mosaic.version = 11 : i64} {
  func.func @conv_pool_kernel(%arg0: i32, %arg1: memref<1x3x6xf32, #tpu.memory_space<vmem>>, %arg2: memref<16x9xf32, #tpu.memory_space<vmem>>, %arg3: memref<16x1xf32, #tpu.memory_space<vmem>>, %arg4: memref<32x48xf32, #tpu.memory_space<vmem>>, %arg5: memref<32x1xf32, #tpu.memory_space<vmem>>, %arg6: memref<6x1xf32, #tpu.memory_space<vmem>>, %arg7: memref<1x32x1xf32, #tpu.memory_space<vmem>>) attributes {dimension_semantics = [#tpu.dimension_semantics<parallel>], iteration_bounds = array<i64: 2>, scalar_prefetch = 0 : i64, scratch_operands = 0 : i64, tpu.core_type = #tpu.core_type<tc>, window_params = [{transform_indices = @transform_0, window_bounds = array<i64: 1, 3, 6>}, {pipeline_mode = #tpu.pipeline_mode<synchronous>, transform_indices = @transform_1, window_bounds = array<i64: 16, 9>}, {pipeline_mode = #tpu.pipeline_mode<synchronous>, transform_indices = @transform_2, window_bounds = array<i64: 16, 1>}, {pipeline_mode = #tpu.pipeline_mode<synchronous>, transform_indices = @transform_3, window_bounds = array<i64: 32, 48>}, {pipeline_mode = #tpu.pipeline_mode<synchronous>, transform_indices = @transform_4, window_bounds = array<i64: 32, 1>}, {pipeline_mode = #tpu.pipeline_mode<synchronous>, transform_indices = @transform_5, window_bounds = array<i64: 6, 1>}, {transform_indices = @transform_6, window_bounds = array<i64: 1, 32, 1>}]} {
    %c0 = arith.constant 0 : index
    %c0_0 = arith.constant 0 : index
    %c0_1 = arith.constant 0 : index
    %0 = vector.load %arg1[%c0, %c0_0, %c0_1] : memref<1x3x6xf32, #tpu.memory_space<vmem>>, vector<1x3x6xf32>
    %1 = vector.shape_cast %0 : vector<1x3x6xf32> to vector<3x6xf32>
    %c0_2 = arith.constant 0 : index
    %c0_3 = arith.constant 0 : index
    %2 = vector.load %arg2[%c0_2, %c0_3] : memref<16x9xf32, #tpu.memory_space<vmem>>, vector<16x9xf32>
    %cst = arith.constant 0.000000e+00 : f32
    %3 = vector.broadcast %cst : f32 to vector<3x1xf32>
    %4 = vector.extract_strided_slice %1 {offsets = [0, 0], sizes = [3, 5], strides = [1, 1]} : vector<3x6xf32> to vector<3x5xf32>
    %5 = tpu.concatenate %3, %4 in 1 : vector<3x1xf32>, vector<3x5xf32> -> vector<3x6xf32>
    %6 = vector.extract_strided_slice %1 {offsets = [0, 1], sizes = [3, 5], strides = [1, 1]} : vector<3x6xf32> to vector<3x5xf32>
    %7 = tpu.concatenate %6, %3 in 1 : vector<3x5xf32>, vector<3x1xf32> -> vector<3x6xf32>
    %8 = tpu.concatenate %5, %1, %7 in 0 : vector<3x6xf32>, vector<3x6xf32>, vector<3x6xf32> -> vector<9x6xf32>
    %cst_4 = arith.constant dense<0.000000e+00> : vector<16x6xf32>
    %9 = tpu.matmul %2, %8, %cst_4 {dimension_numbers = #tpu.dot_dimension_numbers<[1], [0], [0], [1], [0, 0, 1, 1], [], []>} : vector<16x9xf32>, vector<9x6xf32>, vector<16x6xf32> -> vector<16x6xf32>
    %c0_5 = arith.constant 0 : index
    %c0_6 = arith.constant 0 : index
    %10 = vector.load %arg3[%c0_5, %c0_6] : memref<16x1xf32, #tpu.memory_space<vmem>>, vector<16x1xf32>
    %11 = vector.broadcast %10 : vector<16x1xf32> to vector<16x6xf32>
    %12 = arith.addf %9, %11 : vector<16x6xf32>
    %cst_7 = arith.constant 0.000000e+00 : f32
    %13 = vector.broadcast %cst_7 : f32 to vector<16x6xf32>
    %14 = arith.maximumf %12, %13 : vector<16x6xf32>
    %c0_8 = arith.constant 0 : index
    %c0_9 = arith.constant 0 : index
    %15 = vector.load %arg4[%c0_8, %c0_9] : memref<32x48xf32, #tpu.memory_space<vmem>>, vector<32x48xf32>
    %cst_10 = arith.constant 0.000000e+00 : f32
    %16 = vector.broadcast %cst_10 : f32 to vector<16x1xf32>
    %17 = vector.extract_strided_slice %14 {offsets = [0, 0], sizes = [16, 5], strides = [1, 1]} : vector<16x6xf32> to vector<16x5xf32>
    %18 = tpu.concatenate %16, %17 in 1 : vector<16x1xf32>, vector<16x5xf32> -> vector<16x6xf32>
    %19 = vector.extract_strided_slice %14 {offsets = [0, 1], sizes = [16, 5], strides = [1, 1]} : vector<16x6xf32> to vector<16x5xf32>
    %20 = tpu.concatenate %19, %16 in 1 : vector<16x5xf32>, vector<16x1xf32> -> vector<16x6xf32>
    %21 = tpu.concatenate %18, %14, %20 in 0 : vector<16x6xf32>, vector<16x6xf32>, vector<16x6xf32> -> vector<48x6xf32>
    %cst_11 = arith.constant dense<0.000000e+00> : vector<32x6xf32>
    %22 = tpu.matmul %15, %21, %cst_11 {dimension_numbers = #tpu.dot_dimension_numbers<[1], [0], [0], [1], [0, 0, 1, 1], [], []>} : vector<32x48xf32>, vector<48x6xf32>, vector<32x6xf32> -> vector<32x6xf32>
    %c0_12 = arith.constant 0 : index
    %c0_13 = arith.constant 0 : index
    %23 = vector.load %arg5[%c0_12, %c0_13] : memref<32x1xf32, #tpu.memory_space<vmem>>, vector<32x1xf32>
    %24 = vector.broadcast %23 : vector<32x1xf32> to vector<32x6xf32>
    %25 = arith.addf %22, %24 : vector<32x6xf32>
    %cst_14 = arith.constant 0.000000e+00 : f32
    %26 = vector.broadcast %cst_14 : f32 to vector<32x6xf32>
    %27 = arith.maximumf %25, %26 : vector<32x6xf32>
    %c0_15 = arith.constant 0 : index
    %c0_16 = arith.constant 0 : index
    %28 = vector.load %arg6[%c0_15, %c0_16] : memref<6x1xf32, #tpu.memory_space<vmem>>, vector<6x1xf32>
    %cst_17 = arith.constant dense<0.000000e+00> : vector<32x1xf32>
    %29 = tpu.matmul %27, %28, %cst_17 {dimension_numbers = #tpu.dot_dimension_numbers<[1], [0], [0], [1], [0, 0, 1, 1], [], []>} : vector<32x6xf32>, vector<6x1xf32>, vector<32x1xf32> -> vector<32x1xf32>
    %c0_18 = arith.constant 0 : index
    %c0_19 = arith.constant 0 : index
    %c0_20 = arith.constant 0 : index
    %30 = vector.load %arg7[%c0_18, %c0_19, %c0_20] : memref<1x32x1xf32, #tpu.memory_space<vmem>>, vector<1x32x1xf32>
    %31 = vector.shape_cast %30 : vector<1x32x1xf32> to vector<32x1xf32>
    %32 = vector.shape_cast %29 : vector<32x1xf32> to vector<1x32x1xf32>
    tpu.vector_store %arg7[%c0_18, %c0_19, %c0_20], %32 {strides = array<i32>} : memref<1x32x1xf32, #tpu.memory_space<vmem>>, vector<1x32x1xf32>,
    return
  }
  func.func @transform_0(%arg0: i32) -> (i32, i32, i32) {
    %c0_i32 = arith.constant 0 : i32
    %c0_i32_0 = arith.constant 0 : i32
    %c0_i32_1 = arith.constant 0 : i32
    return %arg0, %c0_i32, %c0_i32_0 : i32, i32, i32
  }
  func.func @transform_1(%arg0: i32) -> (i32, i32) {
    %c0_i32 = arith.constant 0 : i32
    %c0_i32_0 = arith.constant 0 : i32
    %c0_i32_1 = arith.constant 0 : i32
    return %c0_i32, %c0_i32_0 : i32, i32
  }
  func.func @transform_2(%arg0: i32) -> (i32, i32) {
    %c0_i32 = arith.constant 0 : i32
    %c0_i32_0 = arith.constant 0 : i32
    %c0_i32_1 = arith.constant 0 : i32
    return %c0_i32, %c0_i32_0 : i32, i32
  }
  func.func @transform_3(%arg0: i32) -> (i32, i32) {
    %c0_i32 = arith.constant 0 : i32
    %c0_i32_0 = arith.constant 0 : i32
    %c0_i32_1 = arith.constant 0 : i32
    return %c0_i32, %c0_i32_0 : i32, i32
  }
  func.func @transform_4(%arg0: i32) -> (i32, i32) {
    %c0_i32 = arith.constant 0 : i32
    %c0_i32_0 = arith.constant 0 : i32
    %c0_i32_1 = arith.constant 0 : i32
    return %c0_i32, %c0_i32_0 : i32, i32
  }
  func.func @transform_5(%arg0: i32) -> (i32, i32) {
    %c0_i32 = arith.constant 0 : i32
    %c0_i32_0 = arith.constant 0 : i32
    %c0_i32_1 = arith.constant 0 : i32
    return %c0_i32, %c0_i32_0 : i32, i32
  }
  func.func @transform_6(%arg0: i32) -> (i32, i32, i32) {
    %c0_i32 = arith.constant 0 : i32
    %c0_i32_0 = arith.constant 0 : i32
    %c0_i32_1 = arith.constant 0 : i32
    return %arg0, %c0_i32, %c0_i32_0 : i32, i32, i32
  }
}

</mosaic_0001>

<bundles_post_ra>
// kernel: net_model1_forward.3
= control target key start
LH: loop header
LB: loop body
LE: loop exit
PB: predicated region body
PF: predicated region fallthrough
CT: control target
= control target key end

     0   :  { %v146_v0 = vmov 0.0|0.0   ;;  %vm147_vm0 = vmmov 0   ;;  %v148_v4 = vmov 0.0   ;;  %vm28_vm1 = vcmask 261120   ;;  %s190_s1 = inlined_call_operand.vmem [shape: f32[32,1], index: 1, kind: input, shape index: {}]   ;;  %s191_s2 = inlined_call_operand.<no memory space> [shape: f32[1,1], index: 2, kind: input, shape index: {}]   ;;  %s192_s0 = inlined_call_operand.vmem [shape: f32[2,32], index: 0, kind: input, shape index: {}]   ;;  %s193_s3 = inlined_call_operand.vmem [shape: f32[2,1], index: 3, kind: output, shape index: {}]  }
   0x1   :  { %133 = vmatprep.subr.bf16.mxu0 %v146_v0  ;;  %v17_v1 = vld [vmem:[%s190_s1] sm:$0xff]  ;;  %v18_v2 = vld [vmem:[%s190_s1 + $0x8] sm:$0xff]  ;;  %v19_v3 = vld [vmem:[%s190_s1 + $0x10] sm:$0xff]  ;;  %130 = vmatprep.mubr.msk.f32.mxu0 %vm147_vm0, %v148_v4  ;;  %v8_v5 = vstv %s191_s2  ;;  %vm108_vm2 = vcmask 1024  }
   0x2   :  { %v134_v6 = vpack.c.bf16 %v18_v2, %v17_v1  ;;  %v20_v7 = vld [vmem:[%s190_s1 + $0x18] sm:$0xff]  ;;  %9 = vst [vmem:[#allocation2] sm:$0x1] %v8_v5  ;;  %v16_v9 = vld [vmem:[%s192_s0] sm:$0x3] }
   0x3   :  { %v137_v8 = vpack.c.bf16 %v20_v7, %v19_v3 }
   0x4   :  { %135 = vmatpush3.bf16.msra.mxu0 %v134_v6 }
   0x5   :  { %136 = vmatprep.subr.bf16.mxu0 %v146_v0 }
   0x8   :  { %138 = vmatpush3.bf16.msra.mxu0 %v137_v8 }
   0x9   :  { %v114_v10 = vld [vmem:[#allocation2] ss:$0 sm:$0xff] }
   0xb   :  { %131 = vmatmul.mubr.msk.f32.vlgmr.msra.gmra.mrb[0].mxu0 %vm28_vm1, %v16_v9 }
  0xde   :  { %v98_v11 = vpop.f32.mrb[0].mxu0 }
  0xdf   :  { %v99_v12 = vadd.f32 %v114_v10, %v98_v11  ;;  %v132_v13 = vpop.f32.mrb[1].mxu0 }
  0xe1   :  { %v116_v14 = vmul.f32 -1.442695, %v99_v12 }
  0xe3   :  { %142 = vpow2.f32 %v116_v14 }
  0xed   :  { %v143_v15 = vpop.eup %142 }
  0xee   :  { %v105_v16 = vadd.f32 1.0, %v143_v15 }
  0xf0   :  { %144 = vrcp.f32 %v105_v16 }
  0xfa   :  { %v145_v17 = vpop.eup %144 }
  0xfb   :  { %109 = vst.msk [vmem:[%s193_s3] sm:$0x3] %vm108_vm2, %v145_v17 }

// kernel: net_model1_forward.2
= control target key start
LH: loop header
LB: loop body
LE: loop exit
PB: predicated region body
PF: predicated region fallthrough
CT: control target
= control target key end

     0   :  { %s854_s21 = smov 0   ;;  %s936_s0 = inlined_call_operand.vmem [shape: f32[2,3,6], index: 0, kind: input, shape index: {}]   ;;  %s937_s1 = inlined_call_operand.vmem [shape: f32[16,9], index: 1, kind: input, shape index: {}]   ;;  %s938_s2 = inlined_call_operand.vmem [shape: f32[16,1], index: 2, kind: input, shape index: {}]   ;;  %s939_s3 = inlined_call_operand.vmem [shape: f32[32,48], index: 3, kind: input, shape index: {}]   ;;  %s940_s4 = inlined_call_operand.vmem [shape: f32[32,1], index: 4, kind: input, shape index: {}]   ;;  %s941_s5 = inlined_call_operand.vmem [shape: f32[6,1], index: 5, kind: input, shape index: {}]   ;;  %s942_s6 = inlined_call_operand.vmem [shape: f32[2,32,1], index: 6, kind: output, shape index: {}]  }
   0x1 LB: > { %s680_s22 = sadd.s32 4294967295, %s813_s21   ;;  %p684_p0 = scmp.ge.s32.totalorder %s813_s21, 1  ;;  %s813_s21 = sphi %s854_s21, %s16_s21  }
   0x2   : > { %p211_p1 = scmp.lt.s32.totalorder %s813_s21, 3 }
   0x4   : > { %p212_p2 = pnand %p684_p0, %p211_p1 }
   0x5   : > { %p240_p3 = scmp.lt.s32.totalorder (!%p212_p2), %s680_s22, 1  ;;  %v250_v0 = vld [vmem:[%s937_s1] sm:$0xff] (!%p212_p2)  ;;  %vm284_vm0 = vcmask (!%p212_p2), 72704   ;;  %s815_s29 = smov (!%p212_p2), 127   ;;  %v816_v3 = vmov (!%p212_p2), 0   ;;  %v273_v4 = vld [vmem:[%s938_s2 + $0x8] sm:$0xff] (!%p212_p2) }
   0x6   : > { %215 = sbr.rel (%p212_p2) target bundleno = 931 (0x3a3), region = 44  ;;  %732 = vmatprep.mubr.msk.f32.mxu0 (!%p212_p2), %vm284_vm0, %v250_v0  ;;  %v272_v2 = vld [vmem:[%s938_s2] sm:$0xff] (!%p212_p2)  ;;  %795 = vset.pattern.permute.xlu1 (!%p212_p2), %v816_v3  ;;  %s817_s10 = smov (!%p212_p2), 1   ;;  %vm261_vm1 = vcmask (!%p212_p2), 39936   ;;  %vm256_vm2 = vcmask (!%p212_p2), 7168   ;;  %vm268_vm3 = vcmask (!%p212_p2), 1042432  }
   0x7   : > { %806 = vset.pattern.permute.xlu0 (!%p212_p2), %v816_v3  ;;  %276 = vperm.xlu1 (!%p212_p2), %795, %v272_v2   ;;  %vm270_vm4 = vcmask (!%p212_p2), 1045504   ;;  %vm291_vm5 = vcmask (!%p212_p2), 1040384   ;;  %vm818_vm6 = vmmov (!%p212_p2), 1   ;;  %v251_v14 = vld [vmem:[%s937_s1 + $0x8] sm:$0xff] (!%p212_p2)  ;;  %v371_v25 = vld [vmem:[%s939_s3] sm:$0xff] (!%p212_p2)  ;;  %vm417_vm8 = vcmask (!%p212_p2), 392192   ;;  %vm691_vm9 = vmneg (!%p212_p2), %vm256_vm2 }
   0x8   : > { %vm762_vm7 = vmpackc.low (!%p212_p2), %vm291_vm5, %vm818_vm6  ;;  %v394_v26 = vld [vmem:[%s940_s4 + $0x8] sm:$0xff] (!%p212_p2)  ;;  %747 = vmatprep.mubr.msk.f32.mxu1 (!%p212_p2), %vm417_vm8, %v371_v25  ;;  %v395_v27 = vld [vmem:[%s940_s4 + $0x10] sm:$0xff] (!%p212_p2)  ;;  %vm520_vm12 = vcmask (!%p212_p2), 48128  }
   0x9   : > { %v393_v28 = vld [vmem:[%s940_s4] sm:$0xff] (!%p212_p2)  ;;  %v396_v29 = vld [vmem:[%s940_s4 + $0x18] sm:$0xff] (!%p212_p2)  ;;  %vm768_vm10 = vmpackc.low (!%p212_p2), %vm691_vm9, %vm691_vm9 }
   0xa   : > { %vm778_vm11 = vmpackc.low (!%p212_p2), %vm261_vm1, %vm261_vm1  ;;  %v372_v38 = vld [vmem:[%s939_s3 + $0x8] sm:$0xff] (!%p212_p2)  ;;  %v373_v39 = vld [vmem:[%s939_s3 + $0x10] sm:$0xff] (!%p212_p2) }
   0xb   : > { %281 = vperm.xlu1 (!%p212_p2), %795, %v273_v4   ;;  %v374_v40 = vld [vmem:[%s939_s3 + $0x18] sm:$0xff] (!%p212_p2)  ;;  %v519_v41 = vld [vmem:[%s941_s5] sm:$0x3f] (!%p212_p2) }
   0xd   : > { %s944_s22 = smov (!%p240_p3, %s680_s22), 1 }
   0xe   : > { %s685_s23 = sshll.u32 %s944_s22, 2  ;;  %s708_s9 = sshll.u32 %s944_s22, 5 }
   0xf   : > { %s243_s28 = scalar_lea.vmem %s936_s0, %s685_s23  ;;  %s248_s12 = scalar_lea.vmem %s942_s6, %s708_s9 }
  0x10   : > { %v249_v1 = vld [vmem:[%s243_s28] sm:$0x7] }
  0x11   : > { %258 = vrot.lane.b32.xlu0 %v249_v1, %s815_s29  ;;  %v263_v6 = vrot.slane %v249_v1, 5 }
  0x15   : > { %253 = vrot.lane.b32.xlu0 %v249_v1, %s817_s10 }
  0x83   : > { %v259_v5 = vpop.permute.xlu0 %258 }
  0x84   : > { %v262_v7 = vsel %vm261_vm1, %v259_v5, 0.0 }
  0x85   : > { %v266_v9 = vrot.slane %v262_v7, 2 }
  0x86   : > { %v277_v15 = vpop.permute.xlu1 %276 }
  0x87   : > { %v254_v8 = vpop.permute.xlu0 %253 }
  0x88   : > { %v257_v10 = vsel %vm256_vm2, 0.0, %v254_v8 }
  0x89   : > { %v269_v11 = vsel %vm268_vm3, %v257_v10, %v263_v6 }
  0x8a   : > { %v271_v12 = vsel %vm270_vm4, %v269_v11, %v266_v9  ;;  %v282_v16 = vpop.permute.xlu1 %281 }
  0x8b   : > { %v761_v13 = vpack.c.bf16 %v266_v9, %v271_v12 }
  0x8d   : > { %763 = vmatprep.subr.msk.bf16.mxu0 %vm762_vm7, %v761_v13 }
  0x8e   : > { %766 = vmatpush3.bf16.msk.msra.mxu0 %vm762_vm7, %v761_v13 }
  0x8f   : > { %753 = vmatprep.subr.msk.mxu0 %vm270_vm4, %v519_v41 }
  0x91   : > { %733 = vmatmul.mubr.msk.f32.vlgmr.msra.gmra.mrb[0].mxu0 %vm284_vm0, %v251_v14 }
  0x92   : > { %754 = vmatpush3.msk.msra.mxu0 %vm270_vm4, %v519_v41 }
 0x164   : > { %v734_v17 = vpop.f32.mrb[0].mxu0 }
 0x165   : > { %v366_v18 = vadd.f32 %v734_v17, %v282_v16  ;;  %v360_v19 = vpop.f32.mrb[1].mxu0 }
 0x166   : > { %v361_v20 = vadd.f32 %v360_v19, %v277_v15 }
 0x167   : > { %v370_v21 = vmax.f32 %v366_v18, 0.0 }
 0x168   : > { %v369_v22 = vmax.f32 %v361_v20, 0.0 }
 0x16a   : > { %v801_v23 = vpack.i.bf16 %v370_v21, %v369_v22  ;;  %v773_v24 = vpack.c.bf16 %v370_v21, %v369_v22 }
 0x16c   : > { %802 = vrot.lane.b32.xlu1 %v801_v23, %s815_s29  ;;  %797 = vrot.lane.b32.xlu0 %v801_v23, %s817_s10 }
 0x170   : > { %404 = vperm.xlu1 %795, %v394_v26   ;;  %399 = vperm.xlu0 %806, %v393_v28  }
 0x174   : > { %409 = vperm.xlu1 %795, %v395_v27   ;;  %414 = vperm.xlu0 %806, %v396_v29  }
 0x1de   : > { %v798_v30 = vpop.permute.xlu0 %797  ;;  %v803_v33 = vpop.permute.xlu1 %802 }
 0x1df   : > { %v800_v31 = vunpack.i.h.bf16 %v798_v30  ;;  %v799_v32 = vunpack.i.l.bf16 %v798_v30  ;;  %v805_v35 = vunpack.i.h.bf16 %v803_v33  ;;  %v804_v36 = vunpack.i.l.bf16 %v803_v33 }
 0x1e1   : > { %v767_v34 = vpack.c.bf16 %v800_v31, %v799_v32  ;;  %v777_v37 = vpack.c.bf16 %v805_v35, %v804_v36 }
 0x1e3   : > { %769 = vmatprep.subr.msk.bf16.mxu1 %vm768_vm10, %v767_v34 }
 0x1e4   : > { %772 = vmatpush3.bf16.msk.msra.mxu1 %vm768_vm10, %v767_v34 }
 0x1e5   : > { %774 = vmatprep.subr.bf16.mxu1 %v773_v24 }
 0x1e8   : > { %776 = vmatpush3.bf16.msra.mxu1 %v773_v24 }
 0x1e9   : > { %779 = vmatprep.subr.msk.bf16.mxu1 %vm778_vm11, %v777_v37 }
 0x1ec   : > { %782 = vmatpush3.bf16.msk.msra.mxu1 %vm778_vm11, %v777_v37 }
 0x1ef   : > { %748 = vmatmul.mubr.msk.f32.vlgmr.msra.gmra.mrb[0].mxu1 %vm417_vm8, %v372_v38  ;;  %v400_v42 = vpop.permute.xlu0 %399  ;;  %v405_v43 = vpop.permute.xlu1 %404 }
 0x1f0   : > { %750 = vmatprep.mubr.msk.f32.mxu1 %vm417_vm8, %v373_v39 }
 0x1f3   : > { %751 = vmatmul.mubr.msk.f32.gmra.mrb[2].mxu1 %vm417_vm8, %v374_v40  ;;  %v415_v48 = vpop.permute.xlu0 %414  ;;  %v410_v51 = vpop.permute.xlu1 %409 }
 0x2c2   : > { %v749_v44 = vpop.f32.mrb[0].mxu1 }
 0x2c3   : > { %v502_v45 = vadd.f32 %v749_v44, %v405_v43  ;;  %v496_v46 = vpop.f32.mrb[1].mxu1 }
 0x2c4   : > { %v497_v47 = vadd.f32 %v496_v46, %v400_v42 }
 0x2c5   : > { %v516_v52 = vmax.f32 %v502_v45, 0.0 }
 0x2c6   : > { %v515_v49 = vmax.f32 %v497_v47, 0.0  ;;  %v752_v50 = vpop.f32.mrb[2].mxu1 }
 0x2c7   : > { %v512_v53 = vadd.f32 %v752_v50, %v415_v48  ;;  %v506_v54 = vpop.f32.mrb[3].mxu1 }
 0x2c8   : > { %v507_v55 = vadd.f32 %v506_v54, %v410_v51  ;;  %755 = vmatprep.mubr.msk.f32.mxu0 %vm520_vm12, %v515_v49 }
 0x2c9   : > { %756 = vmatmul.mubr.msk.f32.vlgmr.msra.gmra.mrb[2].mxu0 %vm520_vm12, %v516_v52  ;;  %v518_v57 = vmax.f32 %v512_v53, 0.0 }
 0x2ca   : > { %v517_v56 = vmax.f32 %v507_v55, 0.0 }
 0x2cc   : > { %758 = vmatprep.mubr.msk.f32.mxu0 %vm520_vm12, %v517_v56 }
 0x2cd   : > { %759 = vmatmul.mubr.msk.f32.gmra.mrb[4].mxu0 %vm520_vm12, %v518_v57 }
 0x39c   : > { %v757_v58 = vpop.f32.mrb[2].mxu0 }
 0x39d   : > { %622 = vst.msk [vmem:[%s248_s12 + $0x8] sm:$0xff] %vm256_vm2, %v757_v58  ;;  %v602_v59 = vpop.f32.mrb[3].mxu0 }
 0x39e   : > { %621 = vst.msk [vmem:[%s248_s12] sm:$0xff] %vm256_vm2, %v602_v59 }
 0x3a0   : > { %v760_v60 = vpop.f32.mrb[4].mxu0 }
 0x3a1   : > { %624 = vst.msk [vmem:[%s248_s12 + $0x18] sm:$0xff] %vm256_vm2, %v760_v60  ;;  %v612_v61 = vpop.f32.mrb[5].mxu0 }
 0x3a2   : > { %623 = vst.msk [vmem:[%s248_s12 + $0x10] sm:$0xff] %vm256_vm2, %v612_v61 }
 0x3a3 PF: > { %s16_s21 = sadd.s32 1, %s813_s21  }
 0x3a4   : > { %p13_p4 = scmp.ge.s32.totalorder %s16_s21, 4  }
 0x3a6   :  { %15 = sbr.rel (!%p13_p4) target bundleno = 1 (0x1), region = 74 }

</bundles_post_ra>
